<compile_context>
chip_gen: v5e
topology: v5e:2x2
jax: 0.10.0
libtpu: 0.0.40
codegen_flags: <defaults>
</compile_context>

<pallas_src>
import jax
import jax.numpy as jnp
from jax.experimental import pallas as pl
from jax.experimental.pallas import tpu as pltpu


# ----------------------------------------------------------------------------
# Kernel 1: fully fused EncoderModel forward for the (small) per-event cluster
# count.  Single invocation, everything resident in VMEM/SMEM.
#
#   w_ref      : (14,)   f32 SMEM — [wc(3,2) row-major, wt(3,2) row-major, bias(2)]
#   coords_ref : (N, 3C) f32 VMEM — cluster i's C voxels laid out [x0,y0,z0,x1,...]
#   lp_ref     : (N, 2)  i32 VMEM — col 0: label in {0,1}, col 1: pick in [0,C)
#   rv_ref     : (N, 3)  f32 VMEM — random voxel used when label == 0
#   o_ref      : (N, 2)  f32 VMEM
# ----------------------------------------------------------------------------
def fused_forward_kernel(w_ref, coords_ref, lp_ref, rv_ref, o_ref):
    c = coords_ref.shape[1] // 3
    cvals = coords_ref[...]                      # (N, 3C)
    label = lp_ref[:, 0:1]                       # (N, 1) int32
    pick = lp_ref[:, 1:2]                        # (N, 1) int32

    vox0 = cvals[:, 0:3]
    csum = vox0
    tvox = vox0                                  # covers pick == 0
    for j in range(1, c):                        # static unroll, pure 2-D lane slices
        vox_j = cvals[:, 3 * j:3 * j + 3]
        csum = csum + vox_j
        tvox = jnp.where(pick == j, vox_j, tvox)
    cm = csum * (1.0 / c)                                    # cluster centroid
    td = jnp.where(label == 1, tvox, rv_ref[...])            # sampled training voxel

    # 12 VPU broadcast FMAs + 2 bias adds; scalars read from SMEM.
    cols = []
    for o in range(2):
        cols.append(cm[:, 0:1] * w_ref[0 + o] + cm[:, 1:2] * w_ref[2 + o]
                    + cm[:, 2:3] * w_ref[4 + o]
                    + td[:, 0:1] * w_ref[6 + o] + td[:, 1:2] * w_ref[8 + o]
                    + td[:, 2:3] * w_ref[10 + o]
                    + w_ref[12 + o])
    o_ref[...] = jnp.concatenate(cols, axis=1)


# ----------------------------------------------------------------------------
# Kernel 2: feature-major fused affine map for large cluster counts.
#   w_ref  : (14,)  f32 SMEM
#   cm_ref : (3, T) f32 VMEM  (centroids, features on sublanes, N on lanes)
#   td_ref : (3, T) f32 VMEM  (sampled voxels)
#   o_ref  : (2, T) f32 VMEM  (lane-dense output)
# ----------------------------------------------------------------------------
def affine_fm_kernel(w_ref, cm_ref, td_ref, o_ref):
    cm = cm_ref[...]
    td = td_ref[...]
    rows = []
    for o in range(2):
        rows.append(cm[0:1, :] * w_ref[0 + o] + cm[1:2, :] * w_ref[2 + o]
                    + cm[2:3, :] * w_ref[4 + o]
                    + td[0:1, :] * w_ref[6 + o] + td[1:2, :] * w_ref[8 + o]
                    + td[2:3, :] * w_ref[10 + o]
                    + w_ref[12 + o])
    o_ref[...] = jnp.concatenate(rows, axis=0)


def fused_affine_map(cm_t, td_t, w14, *, tile_n=None):
    """out[o, n] = sum_k wc[k,o]*cm_t[k,n] + wt[k,o]*td_t[k,n] + b[o]   (Pallas).

    cm_t, td_t: (3, N) float32 feature-major. Returns (2, N) float32."""
    n = cm_t.shape[1]
    smem = pl.BlockSpec(memory_space=pltpu.MemorySpace.SMEM)
    vmem = pl.BlockSpec(memory_space=pltpu.MemorySpace.VMEM)

    if tile_n is None:
        # Big tiles (>= multiple MB of traffic per step) amortize the ~0.35 us
        # per-step pipeline overhead; keep >= 4 grid steps when N is huge so both
        # v7x TensorCores get work.  131072-column cap keeps the double-buffered
        # footprint (~8 MB) well under the 32 MiB scoped VMEM default on all
        # generations (incl. v7x's 64 MiB physical VMEM).
        tile_n = min(max(pl.cdiv(n, 4), 8192), 131072)
    tile_n = pl.cdiv(tile_n, 128) * 128          # lane-aligned blocks

    if n <= tile_n:
        # Single whole-array invocation: no grid, no pipeline, no pad/slice.
        return pl.pallas_call(
            affine_fm_kernel,
            out_shape=jax.ShapeDtypeStruct((2, n), jnp.float32),
            in_specs=[smem, vmem, vmem],
            out_specs=vmem,
        )(w14, cm_t, td_t)

    # Gridded path: no jnp.pad / trailing slice — the ragged last block is
    # handled by Pallas block masking (OOB lanes are read-padded, never stored).
    return pl.pallas_call(
        affine_fm_kernel,
        out_shape=jax.ShapeDtypeStruct((2, n), jnp.float32),
        grid=(pl.cdiv(n, tile_n),),
        in_specs=[
            smem,
            pl.BlockSpec((3, tile_n), lambda i: (0, i)),
            pl.BlockSpec((3, tile_n), lambda i: (0, i)),
        ],
        out_specs=pl.BlockSpec((2, tile_n), lambda i: (0, i)),
        compiler_params=pltpu.CompilerParams(dimension_semantics=("parallel",)),
    )(w14, cm_t, td_t)


# ----------------------------------------------------------------------------
# Parameter init (torch.nn.Linear-style U(-1/sqrt(in), 1/sqrt(in))) + fusion
# ----------------------------------------------------------------------------
def init_linear(key, fan_in, fan_out):
    kw, kb = jax.random.split(key)
    bound = 1.0 / jnp.sqrt(jnp.float32(fan_in))
    w = jax.random.uniform(kw, (fan_in, fan_out), jnp.float32, -bound, bound)
    b = jax.random.uniform(kb, (fan_out,), jnp.float32, -bound, bound)
    return w, b


def fuse_params(w1, b1, w2, b2, w3, b3, enc_w):
    """Collapse node-encoder projection + the 3 activation-free Linears into one
    affine map, split into centroid (wc) and sampled-voxel (wt) input paths."""
    hp = jax.lax.Precision.HIGHEST
    # TODO(synk): the original nn.Sequential Linear(32,16) -> Linear(8,2) is
    # shape-inconsistent (would raise in PyTorch); keep the previous convention
    # of feeding the first 8 of the 16 hidden features forward.
    w23 = jnp.dot(w2[:, :8], w3, precision=hp)                      # (32, 2)
    w_fused = jnp.dot(w1, w23, precision=hp)                        # (67, 2)
    b_fused = (jnp.dot(b1, w23, precision=hp)
               + jnp.dot(b2[:8], w3, precision=hp) + b3)            # (2,)
    wc = jnp.dot(enc_w, w_fused[:64], precision=hp)                 # (3, 2) node encoder folded in
    wt = w_fused[64:]                                               # (3, 2)
    return wc, wt, b_fused


def pack_fused_weights(wc, wt, b_fused):
    # layout consumed by the kernels: w14[2k+o]=wc[k,o], w14[6+2k+o]=wt[k,o], w14[12+o]=b[o]
    return jnp.concatenate([wc.reshape(-1), wt.reshape(-1), b_fused]).astype(jnp.float32)


# ----------------------------------------------------------------------------
# Forward glue reproducing the EncoderModel.forward structure
# ----------------------------------------------------------------------------
def encoder_model_forward(data, w14, key, node_type=0, n_clusts=16, clust_size=8):
    """data: (M, 6) float32 with columns [x, y, z, batch_id, value, type]."""
    # TODO(synk): form_clusters / get_cluster_batch / node_encoder_construct are
    # ragged, data-dependent host-side utilities in the original; the stand-in
    # uses fixed equal-size contiguous clusters (all rows pass the node_type
    # mask in the demo) and a linear node encoder folded into the fused weights.
    coords = data[: n_clusts * clust_size, :3].reshape(n_clusts, clust_size * 3)

    # per-cluster random label / voxel sampling (rd.randint in the original,
    # done deterministically with jax.random here)
    k1, k2, k3 = jax.random.split(key, 3)
    labels = jax.random.randint(k1, (n_clusts,), 0, 2)                          # 0 or 1
    rand_vox = jax.random.randint(k2, (n_clusts, 3), 0, 1025).astype(jnp.float32)
    pick = jax.random.randint(k3, (n_clusts,), 0, clust_size)
    label_pick = jnp.stack([labels, pick], axis=1).astype(jnp.int32)            # (N, 2)

    vmem = pl.BlockSpec(memory_space=pltpu.MemorySpace.VMEM)
    smem = pl.BlockSpec(memory_space=pltpu.MemorySpace.SMEM)
    out = pl.pallas_call(
        fused_forward_kernel,
        out_shape=jax.ShapeDtypeStruct((n_clusts, 2), jnp.float32),
        in_specs=[smem, vmem, vmem, vmem],
        out_specs=vmem,
    )(w14, coords.astype(jnp.float32), label_pick, rand_vox)

    return {"result": [out], "embedding": [out], "true": [labels]}


if __name__ == "__main__":
    key = jax.random.PRNGKey(0)
    k_data, k_l1, k_l2, k_l3, k_enc, k_fwd = jax.random.split(key, 6)

    # synthetic point-cloud data: (M, 6) = [x, y, z, batch, value, type]
    M, n_clusts, clust_size = 128, 16, 8
    coords = jax.random.uniform(k_data, (M, 3), jnp.float32, 0.0, 1024.0)
    data = jnp.concatenate(
        [coords,
         jnp.zeros((M, 1), jnp.float32),     # batch id
         jnp.ones((M, 1), jnp.float32),      # value
         jnp.zeros((M, 1), jnp.float32)],    # type == 0 -> all rows pass node_type mask
        axis=1)

    # raw MLP params (67->32, 32->16, 8->2) + synthetic node-encoder projection (3->64)
    w1, b1 = init_linear(k_l1, 67, 32)
    w2, b2 = init_linear(k_l2, 32, 16)
    w3, b3 = init_linear(k_l3, 8, 2)
    enc_w = jax.random.normal(k_enc, (3, 64), jnp.float32) * 0.02

    # one-time algebraic fusion (outside the kernel / per-call path)
    wc, wt, b_fused = fuse_params(w1, b1, w2, b2, w3, b3, enc_w)
    w14 = pack_fused_weights(wc, wt, b_fused)

    fwd = jax.jit(encoder_model_forward)
    out = fwd(data, w14, k_fwd)
    jax.block_until_ready(out["result"][0])
    assert out["result"][0].shape == (n_clusts, 2)
    assert out["true"][0].shape == (n_clusts,)

    # ---- numerical check: fused kernel vs. unfused reference MLP (f32 pinned) ----
    k1, k2, k3 = jax.random.split(k_fwd, 3)
    labels_ref = jax.random.randint(k1, (n_clusts,), 0, 2)
    rand_vox_ref = jax.random.randint(k2, (n_clusts, 3), 0, 1025).astype(jnp.float32)
    pick_ref = jax.random.randint(k3, (n_clusts,), 0, clust_size)
    assert jnp.array_equal(out["true"][0], labels_ref)

    cm_ref = data[: n_clusts * clust_size, :3].reshape(n_clusts, clust_size, 3).mean(axis=1)
    true_vox = data[jnp.arange(n_clusts) * clust_size + pick_ref, :3]
    td_ref = jnp.where(labels_ref[:, None] == 1, true_vox, rand_vox_ref)
    hp = jax.lax.Precision.HIGHEST
    x_cat = jnp.concatenate([jnp.dot(cm_ref, enc_w, precision=hp), td_ref], axis=1)
    h1 = jnp.dot(x_cat, w1, precision=hp) + b1
    h2 = jnp.dot(h1, w2, precision=hp) + b2
    ref_small = jnp.dot(h2[:, :8], w3, precision=hp) + b3
    assert jnp.allclose(out["result"][0], ref_small, rtol=1e-3, atol=5e-2), (
        float(jnp.max(jnp.abs(out["result"][0] - ref_small))))

    # ---- exercise the feature-major large-N paths (single-shot + ragged grid) ----
    ka, kb = jax.random.split(jax.random.PRNGKey(1))
    n_big = 1500
    big_cm = jax.random.uniform(ka, (3, n_big), jnp.float32, 0.0, 1024.0)
    big_td = jax.random.uniform(kb, (3, n_big), jnp.float32, 0.0, 1024.0)

    ref_rows = []
    for o in range(2):
        ref_rows.append(big_cm[0] * wc[0, o] + big_cm[1] * wc[1, o] + big_cm[2] * wc[2, o]
                        + big_td[0] * wt[0, o] + big_td[1] * wt[1, o] + big_td[2] * wt[2, o]
                        + b_fused[o])
    big_ref = jnp.stack(ref_rows, axis=0)

    out_single = fused_affine_map(big_cm, big_td, w14)             # whole-array, no grid
    jax.block_until_ready(out_single)
    assert out_single.shape == (2, n_big)
    assert jnp.allclose(out_single, big_ref, rtol=1e-5, atol=2e-2)

    out_grid = fused_affine_map(big_cm, big_td, w14, tile_n=512)   # 3 steps, ragged last block
    jax.block_until_ready(out_grid)
    assert jnp.allclose(out_grid, big_ref, rtol=1e-5, atol=2e-2)

    print("KERNEL_OK")
</pallas_src>

<mosaic_0001>
module attributes {stable_mosaic.version = 11 : i64} {
  func.func @fused_forward_kernel(%arg0: memref<14xf32, #tpu.memory_space<smem>>, %arg1: memref<16x24xf32, #tpu.memory_space<vmem>>, %arg2: memref<16x2xi32, #tpu.memory_space<vmem>>, %arg3: memref<16x3xf32, #tpu.memory_space<vmem>>, %arg4: memref<16x2xf32, #tpu.memory_space<vmem>>) attributes {dimension_semantics = [], scalar_prefetch = 0 : i64, scratch_operands = 0 : i64, tpu.core_type = #tpu.core_type<tc>} {
    %c0 = arith.constant 0 : index
    %c0_0 = arith.constant 0 : index
    %0 = vector.load %arg1[%c0, %c0_0] : memref<16x24xf32, #tpu.memory_space<vmem>>, vector<16x24xf32>
    %c0_1 = arith.constant 0 : index
    %c0_2 = arith.constant 0 : index
    %1 = vector.load %arg2[%c0_1, %c0_2] : memref<16x2xi32, #tpu.memory_space<vmem>>, vector<16x1xi32>
    %c0_3 = arith.constant 0 : index
    %c1 = arith.constant 1 : index
    %2 = vector.load %arg2[%c0_3, %c1] : memref<16x2xi32, #tpu.memory_space<vmem>>, vector<16x1xi32>
    %3 = vector.extract_strided_slice %0 {offsets = [0, 0], sizes = [16, 3], strides = [1, 1]} : vector<16x24xf32> to vector<16x3xf32>
    %4 = vector.extract_strided_slice %0 {offsets = [0, 3], sizes = [16, 3], strides = [1, 1]} : vector<16x24xf32> to vector<16x3xf32>
    %5 = arith.addf %3, %4 : vector<16x3xf32>
    %c1_i32 = arith.constant 1 : i32
    %6 = vector.broadcast %c1_i32 : i32 to vector<16x1xi32>
    %7 = arith.cmpi eq, %2, %6 : vector<16x1xi32>
    %8 = vector.shape_cast %7 : vector<16x1xi1> to vector<16x1xi1>
    %9 = vector.broadcast %8 : vector<16x1xi1> to vector<16x3xi1>
    %10 = arith.select %9, %4, %3 : vector<16x3xi1>, vector<16x3xf32>
    %11 = vector.extract_strided_slice %0 {offsets = [0, 6], sizes = [16, 3], strides = [1, 1]} : vector<16x24xf32> to vector<16x3xf32>
    %12 = arith.addf %5, %11 : vector<16x3xf32>
    %c2_i32 = arith.constant 2 : i32
    %13 = vector.broadcast %c2_i32 : i32 to vector<16x1xi32>
    %14 = arith.cmpi eq, %2, %13 : vector<16x1xi32>
    %15 = vector.shape_cast %14 : vector<16x1xi1> to vector<16x1xi1>
    %16 = vector.broadcast %15 : vector<16x1xi1> to vector<16x3xi1>
    %17 = arith.select %16, %11, %10 : vector<16x3xi1>, vector<16x3xf32>
    %18 = vector.extract_strided_slice %0 {offsets = [0, 9], sizes = [16, 3], strides = [1, 1]} : vector<16x24xf32> to vector<16x3xf32>
    %19 = arith.addf %12, %18 : vector<16x3xf32>
    %c3_i32 = arith.constant 3 : i32
    %20 = vector.broadcast %c3_i32 : i32 to vector<16x1xi32>
    %21 = arith.cmpi eq, %2, %20 : vector<16x1xi32>
    %22 = vector.shape_cast %21 : vector<16x1xi1> to vector<16x1xi1>
    %23 = vector.broadcast %22 : vector<16x1xi1> to vector<16x3xi1>
    %24 = arith.select %23, %18, %17 : vector<16x3xi1>, vector<16x3xf32>
    %25 = vector.extract_strided_slice %0 {offsets = [0, 12], sizes = [16, 3], strides = [1, 1]} : vector<16x24xf32> to vector<16x3xf32>
    %26 = arith.addf %19, %25 : vector<16x3xf32>
    %c4_i32 = arith.constant 4 : i32
    %27 = vector.broadcast %c4_i32 : i32 to vector<16x1xi32>
    %28 = arith.cmpi eq, %2, %27 : vector<16x1xi32>
    %29 = vector.shape_cast %28 : vector<16x1xi1> to vector<16x1xi1>
    %30 = vector.broadcast %29 : vector<16x1xi1> to vector<16x3xi1>
    %31 = arith.select %30, %25, %24 : vector<16x3xi1>, vector<16x3xf32>
    %32 = vector.extract_strided_slice %0 {offsets = [0, 15], sizes = [16, 3], strides = [1, 1]} : vector<16x24xf32> to vector<16x3xf32>
    %33 = arith.addf %26, %32 : vector<16x3xf32>
    %c5_i32 = arith.constant 5 : i32
    %34 = vector.broadcast %c5_i32 : i32 to vector<16x1xi32>
    %35 = arith.cmpi eq, %2, %34 : vector<16x1xi32>
    %36 = vector.shape_cast %35 : vector<16x1xi1> to vector<16x1xi1>
    %37 = vector.broadcast %36 : vector<16x1xi1> to vector<16x3xi1>
    %38 = arith.select %37, %32, %31 : vector<16x3xi1>, vector<16x3xf32>
    %39 = vector.extract_strided_slice %0 {offsets = [0, 18], sizes = [16, 3], strides = [1, 1]} : vector<16x24xf32> to vector<16x3xf32>
    %40 = arith.addf %33, %39 : vector<16x3xf32>
    %c6_i32 = arith.constant 6 : i32
    %41 = vector.broadcast %c6_i32 : i32 to vector<16x1xi32>
    %42 = arith.cmpi eq, %2, %41 : vector<16x1xi32>
    %43 = vector.shape_cast %42 : vector<16x1xi1> to vector<16x1xi1>
    %44 = vector.broadcast %43 : vector<16x1xi1> to vector<16x3xi1>
    %45 = arith.select %44, %39, %38 : vector<16x3xi1>, vector<16x3xf32>
    %46 = vector.extract_strided_slice %0 {offsets = [0, 21], sizes = [16, 3], strides = [1, 1]} : vector<16x24xf32> to vector<16x3xf32>
    %47 = arith.addf %40, %46 : vector<16x3xf32>
    %c7_i32 = arith.constant 7 : i32
    %48 = vector.broadcast %c7_i32 : i32 to vector<16x1xi32>
    %49 = arith.cmpi eq, %2, %48 : vector<16x1xi32>
    %50 = vector.shape_cast %49 : vector<16x1xi1> to vector<16x1xi1>
    %51 = vector.broadcast %50 : vector<16x1xi1> to vector<16x3xi1>
    %52 = arith.select %51, %46, %45 : vector<16x3xi1>, vector<16x3xf32>
    %cst = arith.constant 1.250000e-01 : f32
    %53 = vector.broadcast %cst : f32 to vector<16x3xf32>
    %54 = arith.mulf %47, %53 : vector<16x3xf32>
    %c1_i32_4 = arith.constant 1 : i32
    %55 = vector.broadcast %c1_i32_4 : i32 to vector<16x1xi32>
    %56 = arith.cmpi eq, %1, %55 : vector<16x1xi32>
    %c0_5 = arith.constant 0 : index
    %c0_6 = arith.constant 0 : index
    %57 = vector.load %arg3[%c0_5, %c0_6] : memref<16x3xf32, #tpu.memory_space<vmem>>, vector<16x3xf32>
    %58 = vector.shape_cast %56 : vector<16x1xi1> to vector<16x1xi1>
    %59 = vector.broadcast %58 : vector<16x1xi1> to vector<16x3xi1>
    %60 = arith.select %59, %52, %57 : vector<16x3xi1>, vector<16x3xf32>
    %61 = vector.extract_strided_slice %54 {offsets = [0, 0], sizes = [16, 1], strides = [1, 1]} : vector<16x3xf32> to vector<16x1xf32>
    %c0_7 = arith.constant 0 : index
    %62 = memref.load %arg0[%c0_7] : memref<14xf32, #tpu.memory_space<smem>>
    %63 = vector.broadcast %62 : f32 to vector<16x1xf32>
    %64 = arith.mulf %61, %63 : vector<16x1xf32>
    %65 = vector.extract_strided_slice %54 {offsets = [0, 1], sizes = [16, 1], strides = [1, 1]} : vector<16x3xf32> to vector<16x1xf32>
    %c2 = arith.constant 2 : index
    %66 = memref.load %arg0[%c2] : memref<14xf32, #tpu.memory_space<smem>>
    %67 = vector.broadcast %66 : f32 to vector<16x1xf32>
    %68 = arith.mulf %65, %67 : vector<16x1xf32>
    %69 = arith.addf %64, %68 : vector<16x1xf32>
    %70 = vector.extract_strided_slice %54 {offsets = [0, 2], sizes = [16, 1], strides = [1, 1]} : vector<16x3xf32> to vector<16x1xf32>
    %c4 = arith.constant 4 : index
    %71 = memref.load %arg0[%c4] : memref<14xf32, #tpu.memory_space<smem>>
    %72 = vector.broadcast %71 : f32 to vector<16x1xf32>
    %73 = arith.mulf %70, %72 : vector<16x1xf32>
    %74 = arith.addf %69, %73 : vector<16x1xf32>
    %75 = vector.extract_strided_slice %60 {offsets = [0, 0], sizes = [16, 1], strides = [1, 1]} : vector<16x3xf32> to vector<16x1xf32>
    %c6 = arith.constant 6 : index
    %76 = memref.load %arg0[%c6] : memref<14xf32, #tpu.memory_space<smem>>
    %77 = vector.broadcast %76 : f32 to vector<16x1xf32>
    %78 = arith.mulf %75, %77 : vector<16x1xf32>
    %79 = arith.addf %74, %78 : vector<16x1xf32>
    %80 = vector.extract_strided_slice %60 {offsets = [0, 1], sizes = [16, 1], strides = [1, 1]} : vector<16x3xf32> to vector<16x1xf32>
    %c8 = arith.constant 8 : index
    %81 = memref.load %arg0[%c8] : memref<14xf32, #tpu.memory_space<smem>>
    %82 = vector.broadcast %81 : f32 to vector<16x1xf32>
    %83 = arith.mulf %80, %82 : vector<16x1xf32>
    %84 = arith.addf %79, %83 : vector<16x1xf32>
    %85 = vector.extract_strided_slice %60 {offsets = [0, 2], sizes = [16, 1], strides = [1, 1]} : vector<16x3xf32> to vector<16x1xf32>
    %c10 = arith.constant 10 : index
    %86 = memref.load %arg0[%c10] : memref<14xf32, #tpu.memory_space<smem>>
    %87 = vector.broadcast %86 : f32 to vector<16x1xf32>
    %88 = arith.mulf %85, %87 : vector<16x1xf32>
    %89 = arith.addf %84, %88 : vector<16x1xf32>
    %c12 = arith.constant 12 : index
    %90 = memref.load %arg0[%c12] : memref<14xf32, #tpu.memory_space<smem>>
    %91 = vector.broadcast %90 : f32 to vector<16x1xf32>
    %92 = arith.addf %89, %91 : vector<16x1xf32>
    %93 = vector.extract_strided_slice %54 {offsets = [0, 0], sizes = [16, 1], strides = [1, 1]} : vector<16x3xf32> to vector<16x1xf32>
    %c1_8 = arith.constant 1 : index
    %94 = memref.load %arg0[%c1_8] : memref<14xf32, #tpu.memory_space<smem>>
    %95 = vector.broadcast %94 : f32 to vector<16x1xf32>
    %96 = arith.mulf %93, %95 : vector<16x1xf32>
    %97 = vector.extract_strided_slice %54 {offsets = [0, 1], sizes = [16, 1], strides = [1, 1]} : vector<16x3xf32> to vector<16x1xf32>
    %c3 = arith.constant 3 : index
    %98 = memref.load %arg0[%c3] : memref<14xf32, #tpu.memory_space<smem>>
    %99 = vector.broadcast %98 : f32 to vector<16x1xf32>
    %100 = arith.mulf %97, %99 : vector<16x1xf32>
    %101 = arith.addf %96, %100 : vector<16x1xf32>
    %102 = vector.extract_strided_slice %54 {offsets = [0, 2], sizes = [16, 1], strides = [1, 1]} : vector<16x3xf32> to vector<16x1xf32>
    %c5 = arith.constant 5 : index
    %103 = memref.load %arg0[%c5] : memref<14xf32, #tpu.memory_space<smem>>
    %104 = vector.broadcast %103 : f32 to vector<16x1xf32>
    %105 = arith.mulf %102, %104 : vector<16x1xf32>
    %106 = arith.addf %101, %105 : vector<16x1xf32>
    %107 = vector.extract_strided_slice %60 {offsets = [0, 0], sizes = [16, 1], strides = [1, 1]} : vector<16x3xf32> to vector<16x1xf32>
    %c7 = arith.constant 7 : index
    %108 = memref.load %arg0[%c7] : memref<14xf32, #tpu.memory_space<smem>>
    %109 = vector.broadcast %108 : f32 to vector<16x1xf32>
    %110 = arith.mulf %107, %109 : vector<16x1xf32>
    %111 = arith.addf %106, %110 : vector<16x1xf32>
    %112 = vector.extract_strided_slice %60 {offsets = [0, 1], sizes = [16, 1], strides = [1, 1]} : vector<16x3xf32> to vector<16x1xf32>
    %c9 = arith.constant 9 : index
    %113 = memref.load %arg0[%c9] : memref<14xf32, #tpu.memory_space<smem>>
    %114 = vector.broadcast %113 : f32 to vector<16x1xf32>
    %115 = arith.mulf %112, %114 : vector<16x1xf32>
    %116 = arith.addf %111, %115 : vector<16x1xf32>
    %117 = vector.extract_strided_slice %60 {offsets = [0, 2], sizes = [16, 1], strides = [1, 1]} : vector<16x3xf32> to vector<16x1xf32>
    %c11 = arith.constant 11 : index
    %118 = memref.load %arg0[%c11] : memref<14xf32, #tpu.memory_space<smem>>
    %119 = vector.broadcast %118 : f32 to vector<16x1xf32>
    %120 = arith.mulf %117, %119 : vector<16x1xf32>
    %121 = arith.addf %116, %120 : vector<16x1xf32>
    %c13 = arith.constant 13 : index
    %122 = memref.load %arg0[%c13] : memref<14xf32, #tpu.memory_space<smem>>
    %123 = vector.broadcast %122 : f32 to vector<16x1xf32>
    %124 = arith.addf %121, %123 : vector<16x1xf32>
    %125 = tpu.concatenate %92, %124 in 1 : vector<16x1xf32>, vector<16x1xf32> -> vector<16x2xf32>
    %c0_9 = arith.constant 0 : index
    %c0_10 = arith.constant 0 : index
    %126 = vector.load %arg4[%c0_9, %c0_10] : memref<16x2xf32, #tpu.memory_space<vmem>>, vector<16x2xf32>
    tpu.vector_store %arg4[%c0_9, %c0_10], %125 {strides = array<i32>} : memref<16x2xf32, #tpu.memory_space<vmem>>, vector<16x2xf32>,
    return
  }
}

</mosaic_0001>

<bundles_post_ra>
// kernel: encoder_model_forward.3
= control target key start
LH: loop header
LB: loop body
LE: loop exit
PB: predicated region body
PF: predicated region fallthrough
CT: control target
= control target key end

     0   :  { %9 = vsyncpa [#allocation3], 0  ;;  %s490_s18 = smov [#allocation2]   ;;  %s689_s0 = inlined_call_operand.vmem [shape: f32[14], index: 0, kind: input, shape index: {}]   ;;  %s690_s1 = inlined_call_operand.vmem [shape: f32[16,24], index: 1, kind: input, shape index: {}]   ;;  %s691_s2 = inlined_call_operand.vmem [shape: s32[16,2], index: 2, kind: input, shape index: {}]   ;;  %s692_s3 = inlined_call_operand.vmem [shape: f32[16,3], index: 3, kind: input, shape index: {}]   ;;  %s693_s4 = inlined_call_operand.vmem [shape: f32[16,2], index: 4, kind: output, shape index: {}]  }
   0x1   :  { %s15_s17 = sshll.u32 %s689_s0, 4  ;;  %s16_s17 = int_to_ptr.vmem [resolvable:$true] %s15_s17 }
   0x2   :  { %18 = dma.vmem_to_smem %s16_s17, 16, %s490_s18, [#allocation3]  }
   0x3   :  { %488 = dma.done.wait [#allocation3], 16  }
   0x4   :  { %489 = vsyncadd [#allocation3], 4294967280 }
   0x5   :  { %29 = sfence }
   0x6   :  { %v538_v0 = vld [vmem:[%s691_s2] sm:$0xff]  ;;  %v491_v2 = vmov 1   ;;  %s492_s0 = smov 3   ;;  %v493_v3 = vmov 0   ;;  %v554_v5 = vld [vmem:[%s691_s2 + $0x8] sm:$0xff]  ;;  %s495_s2 = smov 125  }
   0x7   :  { %v543_v1 = vld [vmem:[%s690_s1] sm:$0xff]  ;;  %471 = vset.pattern.permute.xlu0 %v491_v2  ;;  %vm44_vm0 = vcmp.eq.s32.totalorder %v538_v0, 1  ;;  %472 = vset.pattern.permute.xlu2 %v491_v2  ;;  %vm45_vm1 = vcmp.eq.s32.totalorder %v554_v5, 1  ;;  %v561_v6 = vld [vmem:[%s690_s1 + $0x8] sm:$0xff]  ;;  %vm72_vm2 = vcmp.eq.s32.totalorder %v538_v0, 2  ;;  %vm73_vm3 = vcmp.eq.s32.totalorder %v554_v5, 2 }
   0x8   :  { %56 = vrot.lane.b32.xlu1 %v543_v1, %s492_s0  ;;  %v549_v4 = vsel %vm44_vm0, 1, %v493_v3  ;;  %v564_v7 = vsel %vm45_vm1, 1, %v493_v3  ;;  %v74_v8 = vsel %vm72_vm2, 1, %v493_v3  ;;  %v75_v9 = vsel %vm73_vm3, 1, %v493_v3  ;;  %s494_s1 = smov 122   ;;  %s496_s27 = smov 119  }
   0x9   :  { %473 = vset.pattern.permute.xlu1 %v491_v2  ;;  %49 = vperm.xlu0 %471, %v549_v4   ;;  %vm102_vm4 = vcmp.eq.s32.totalorder %v538_v0, 3  ;;  %vm103_vm6 = vcmp.eq.s32.totalorder %v554_v5, 3  ;;  %vm132_vm8 = vcmp.eq.s32.totalorder %v538_v0, 4  ;;  %vm133_vm11 = vcmp.eq.s32.totalorder %v554_v5, 4  ;;  %s497_s28 = smov 116   ;;  %s498_s29 = smov 113  }
   0xa   :  { %77 = vperm.xlu2 %472, %v74_v8   ;;  %v104_v10 = vsel %vm102_vm4, 1, %v493_v3  ;;  %v105_v16 = vsel %vm103_vm6, 1, %v493_v3  ;;  %v134_v18 = vsel %vm132_vm8, 1, %v493_v3  ;;  %v135_v25 = vsel %vm133_vm11, 1, %v493_v3  ;;  %s499_s30 = smov 107   ;;  %s500_s5 = smov 110  }
   0xb   :  { %vm162_vm13 = vcmp.eq.s32.totalorder %v538_v0, 5  ;;  %vm163_vm15 = vcmp.eq.s32.totalorder %v554_v5, 5  ;;  %vm192_vm0 = vcmp.eq.s32.totalorder %v538_v0, 6  ;;  %vm193_vm2 = vcmp.eq.s32.totalorder %v554_v5, 6  ;;  %v246_v59 = vld [vmem:[%s692_s3] sm:$0xff]  ;;  %s501_s8 = smov 21  }
   0xc   :  { %v164_v30 = vsel %vm162_vm13, 1, %v493_v3  ;;  %v165_v33 = vsel %vm163_vm15, 1, %v493_v3  ;;  %v194_v34 = vsel %vm192_vm0, 1, %v493_v3  ;;  %v195_v39 = vsel %vm193_vm2, 1, %v493_v3  ;;  %s449_s11 = sld [smem:[#allocation2 + $0x5]]  ;;  %s503_s13 = smov 127  }
   0xd   :  { %vm223_vm4 = vcmp.eq.s32.totalorder %v554_v5, 7  ;;  %s448_s12 = sld [smem:[#allocation2 + $0x3]]  ;;  %s504_s17 = smov 106   ;;  %vm433_vm15 = vcmask 15360  }
   0xe   :  { %v225_v42 = vsel %vm223_vm4, 1, %v493_v3  ;;  %s451_s14 = sld [smem:[#allocation2 + $0x9]]  ;;  %s505_s20 = smov 105  }
   0xf   :  { %s450_s15 = sld [smem:[#allocation2 + $0x7]]  ;;  %s506_s25 = smov 1  }
  0x10   :  { %58 = vrot.lane.b32.xlu1 %v561_v6, %s492_s0  ;;  %s452_s16 = sld [smem:[#allocation2 + $0xb]] }
  0x11   :  { %52 = vperm.xlu0 %471, %v564_v7   ;;  %s442_s18 = sld [smem:[#allocation2 + $0x4]] }
  0x12   :  { %80 = vperm.xlu2 %472, %v75_v9   ;;  %s441_s19 = sld [smem:[#allocation2 + $0x2]] }
  0x13   :  { %s443_s21 = sld [smem:[#allocation2 + $0x6]] }
  0x14   :  { %s444_s22 = sld [smem:[#allocation2 + $0x8]] }
  0x15   :  { %s447_s23 = sld [smem:[#allocation2 + $0x1]] }
  0x16   :  { %s453_s24 = sld [smem:[#allocation2 + $0xd]] }
  0x17   :  { %s266_s26 = sld [smem:[#allocation2]] }
  0x1a   :  { %107 = vperm.xlu2 %472, %v104_v10  }
  0x64   :  { %v78_v19 = vpop.permute.xlu2 %77 }
  0x65   :  { %vm82_vm9 = vcmp.eq.s32.totalorder %v78_v19, 1 }
  0x6c   :  { %v81_v22 = vpop.permute.xlu2 %80 }
  0x6d   :  { %vm83_vm10 = vcmp.eq.s32.totalorder %v81_v22, 1 }
  0x74   :  { %v108_v26 = vpop.permute.xlu2 %107 }
  0x75   :  { %vm112_vm14 = vcmp.eq.s32.totalorder %v108_v26, 1 }
  0x7a   :  { %v57_v11 = vpop.permute.xlu1 %56 }
  0x7b   :  { %v50_v12 = vpop.permute.xlu0 %49 }
  0x7c   :  { %vm54_vm5 = vcmp.eq.s32.totalorder %v50_v12, 1 }
  0x7d   :  { %v62_v13 = vsel %vm54_vm5, %v543_v1, %v57_v11 }
  0x7e   :  { %86 = vrot.lane.b32.xlu0 %v62_v13, %s492_s0 }
  0x82   :  { %v59_v14 = vpop.permute.xlu1 %58 }
  0x83   :  { %v53_v15 = vpop.permute.xlu0 %52 }
  0x84   :  { %vm55_vm7 = vcmp.eq.s32.totalorder %v53_v15, 1 }
  0x85   :  { %v63_v17 = vsel %vm55_vm7, %v561_v6, %v59_v14  ;;  %vm222_vm7 = vcmp.eq.s32.totalorder %v538_v0, 7 }
  0x86   :  { %110 = vperm.xlu0 %471, %v105_v16   ;;  %88 = vrot.lane.b32.xlu1 %v63_v17, %s492_s0  ;;  %v224_v49 = vsel %vm222_vm7, 1, %v493_v3 }
  0x8e   :  { %137 = vperm.xlu0 %471, %v134_v18  }
  0xf0   :  { %v87_v20 = vpop.permute.xlu0 %86 }
  0xf1   :  { %v92_v21 = vsel %vm82_vm9, %v543_v1, %v87_v20  ;;  %v363_v20 = vstv %s449_s11 }
  0xf2   :  { %116 = vrot.lane.b32.xlu1 %v92_v21, %s492_s0  ;;  %v349_v21 = vstv %s448_s12 }
  0xf8   :  { %v89_v23 = vpop.permute.xlu1 %88  ;;  %v111_v27 = vpop.permute.xlu0 %110 }
  0xf9   :  { %v93_v24 = vsel %vm83_vm10, %v561_v6, %v89_v23  ;;  %vm113_vm12 = vcmp.eq.s32.totalorder %v111_v27, 1 }
  0xfa   :  { %118 = vrot.lane.b32.xlu2 %v93_v24, %s492_s0  ;;  %140 = vperm.xlu1 %473, %v135_v25  }
 0x100   :  { %v138_v35 = vpop.permute.xlu0 %137 }
 0x101   :  { %vm142_vm1 = vcmp.eq.s32.totalorder %v138_v35, 1 }
 0x102   :  { %167 = vperm.xlu1 %473, %v164_v30  }
 0x10a   :  { %475 = vset.pattern.permute.xlu1 %v493_v3 }
 0x154   :  { %v119_v28 = vpop.permute.xlu2 %118 }
 0x155   :  { %v123_v29 = vsel %vm113_vm12, %v561_v6, %v119_v28 }
 0x156   :  { %148 = vrot.lane.b32.xlu0 %v123_v29, %s492_s0 }
 0x164   :  { %v117_v31 = vpop.permute.xlu1 %116 }
 0x165   :  { %v122_v32 = vsel %vm112_vm14, %v543_v1, %v117_v31  ;;  %vm430_vm14 = vcmask 7168  }
 0x166   :  { %146 = vrot.lane.b32.xlu2 %v122_v32, %s492_s0 }
 0x16c   :  { %v141_v38 = vpop.permute.xlu1 %140 }
 0x16d   :  { %vm143_vm3 = vcmp.eq.s32.totalorder %v141_v38, 1  ;;  %v391_v38 = vstv %s451_s14 }
 0x16e   :  { %170 = vperm.xlu2 %472, %v165_v33  }
 0x174   :  { %v168_v43 = vpop.permute.xlu1 %167 }
 0x175   :  { %vm172_vm5 = vcmp.eq.s32.totalorder %v168_v43, 1 }
 0x176   :  { %197 = vperm.xlu2 %472, %v194_v34  }
 0x17e   :  { %64 = vrot.lane.b32.xlu2 %v543_v1, %s494_s1 }
 0x1c0   :  { %v147_v36 = vpop.permute.xlu2 %146 }
 0x1c1   :  { %v152_v37 = vsel %vm142_vm1, %v543_v1, %v147_v36 }
 0x1c2   :  { %176 = vrot.lane.b32.xlu0 %v152_v37, %s492_s0 }
 0x1c8   :  { %v149_v40 = vpop.permute.xlu0 %148  ;;  %v171_v46 = vpop.permute.xlu2 %170 }
 0x1c9   :  { %v153_v41 = vsel %vm143_vm3, %v561_v6, %v149_v40  ;;  %vm173_vm6 = vcmp.eq.s32.totalorder %v171_v46, 1 }
 0x1ca   :  { %200 = vperm.xlu0 %471, %v195_v39   ;;  %178 = vrot.lane.b32.xlu1 %v153_v41, %s492_s0  ;;  %v377_v39 = vstv %s450_s15 }
 0x1d0   :  { %v198_v50 = vpop.permute.xlu2 %197 }
 0x1d1   :  { %vm202_vm9 = vcmp.eq.s32.totalorder %v198_v50, 1 }
 0x1d2   :  { %36 = vrot.lane.b32.xlu0 %v543_v1, %s495_s2  ;;  %38 = vrot.lane.b32.xlu1 %v561_v6, %s495_s2 }
 0x1d8   :  { %v65_v52 = vpop.permute.xlu2 %64 }
 0x1da   :  { %66 = vrot.lane.b32.xlu0 %v561_v6, %s494_s1  ;;  %94 = vrot.lane.b32.xlu1 %v543_v1, %s496_s27  ;;  %s446_s1 = sld [smem:[#allocation2 + $0xc]] }
 0x1e2   :  { %124 = vrot.lane.b32.xlu0 %v543_v1, %s497_s28 }
 0x1ea   :  { %156 = vrot.lane.b32.xlu0 %v561_v6, %s498_s29 }
 0x1f2   :  { %214 = vrot.lane.b32.xlu0 %v543_v1, %s499_s30 }
 0x1fa   :  { %230 = vperm.xlu0 %471, %v225_v42  }
 0x202   :  { %474 = vset.pattern.permute.xlu0 %v493_v3 }
 0x203   :  { %249 = vperm.xlu0 %474, %v549_v4   ;;  %v247_v4 = vld [vmem:[%s692_s3 + $0x8] sm:$0xff]  ;;  %s502_s3 = smov 126  }
 0x234   :  { %v177_v44 = vpop.permute.xlu0 %176 }
 0x235   :  { %v182_v45 = vsel %vm172_vm5, %v543_v1, %v177_v44 }
 0x236   :  { %206 = vrot.lane.b32.xlu1 %v182_v45, %s492_s0 }
 0x23c   :  { %v179_v47 = vpop.permute.xlu1 %178  ;;  %v201_v51 = vpop.permute.xlu0 %200 }
 0x23d   :  { %v183_v48 = vsel %vm173_vm6, %v561_v6, %v179_v47  ;;  %vm203_vm8 = vcmp.eq.s32.totalorder %v201_v51, 1  ;;  %v285_v51 = vstv %s442_s18 }
 0x23e   :  { %126 = vrot.lane.b32.xlu1 %v561_v6, %s497_s28  ;;  %208 = vrot.lane.b32.xlu2 %v183_v48, %s492_s0  ;;  %v405_v48 = vstv %s452_s16 }
 0x244   :  { %v37_v53 = vpop.permute.xlu0 %36  ;;  %v39_v54 = vpop.permute.xlu1 %38 }
 0x245   :  { %v42_v62 = vadd.f32 %v37_v53, %v543_v1  ;;  %v43_v3 = vadd.f32 %v39_v54, %v561_v6 }
 0x246   :  { %184 = vrot.lane.b32.xlu1 %v543_v1, %s500_s5  ;;  %96 = vrot.lane.b32.xlu2 %v561_v6, %s496_s27 }
 0x247   :  { %v70_v2 = vadd.f32 %v65_v52, %v42_v62  ;;  %v271_v52 = vstv %s441_s19 }
 0x24c   :  { %v67_v57 = vpop.permute.xlu0 %66  ;;  %v95_v58 = vpop.permute.xlu1 %94 }
 0x24d   :  { %v100_v8 = vadd.f32 %v95_v58, %v70_v2  ;;  %v71_v9 = vadd.f32 %v67_v57, %v43_v3 }
 0x24e   :  { %216 = vrot.lane.b32.xlu1 %v561_v6, %s499_s30  ;;  %154 = vrot.lane.b32.xlu2 %v543_v1, %s498_s29 }
 0x254   :  { %v125_v60 = vpop.permute.xlu0 %124 }
 0x255   :  { %v130_v12 = vadd.f32 %v125_v60, %v100_v8 }
 0x256   :  { %186 = vrot.lane.b32.xlu2 %v561_v6, %s500_s5  ;;  %252 = vperm.xlu1 %475, %v564_v7  }
 0x25c   :  { %v157_v5 = vpop.permute.xlu0 %156 }
 0x25e   :  { %227 = vperm.xlu2 %472, %v224_v49  }
 0x264   :  { %v215_v17 = vpop.permute.xlu0 %214 }
 0x26c   :  { %v231_v33 = vpop.permute.xlu0 %230 }
 0x26d   :  { %vm233_vm12 = vcmp.eq.s32.totalorder %v231_v33, 1 }
 0x275   :  { %v250_v36 = vpop.permute.xlu0 %249 }
 0x276   :  { %vm254_vm10 = vcmp.eq.s32.totalorder %v250_v36, 1  ;;  %v267_v36 = vstv %s266_s26 }
 0x298   :  { %v209_v55 = vpop.permute.xlu2 %208 }
 0x299   :  { %v213_v56 = vsel %vm203_vm8, %v561_v6, %v209_v55 }
 0x29a   :  { %238 = vrot.lane.b32.xlu2 %v213_v56, %s492_s0  ;;  %v299_v56 = vstv %s443_s21 }
 0x2a0   :  { %v97_v0 = vpop.permute.xlu2 %96 }
 0x2a1   :  { %v101_v11 = vadd.f32 %v97_v0, %v71_v9 }
 0x2a2   :  { %258 = vrot.lane.b32.xlu2 %v246_v59, %s501_s8  ;;  %v313_v59 = vstv %s444_s22 }
 0x2a8   :  { %v207_v61 = vpop.permute.xlu1 %206  ;;  %v155_v10 = vpop.permute.xlu2 %154 }
 0x2a9   :  { %v212_v63 = vsel %vm202_vm9, %v543_v1, %v207_v61  ;;  %v160_v13 = vadd.f32 %v155_v10, %v130_v12 }
 0x2aa   :  { %236 = vrot.lane.b32.xlu1 %v212_v63, %s492_s0  ;;  %s445_s0 = sld [smem:[#allocation2 + $0xa]] }
 0x2b0   :  { %v127_v7 = vpop.permute.xlu1 %126  ;;  %v187_v23 = vpop.permute.xlu2 %186  ;;  %v327_v60 = vstv %s445_s0 }
 0x2b1   :  { %v131_v14 = vadd.f32 %v127_v7, %v101_v11  ;;  %v345_v7 = vstv %s447_s23 }
 0x2b2   :  { %260 = vrot.lane.b32.xlu1 %v247_v4, %s501_s8 }
 0x2b3   :  { %v161_v18 = vadd.f32 %v157_v5, %v131_v14 }
 0x2b5   :  { %v191_v24 = vadd.f32 %v187_v23, %v161_v18 }
 0x2b8   :  { %v185_v15 = vpop.permute.xlu1 %184  ;;  %v228_v32 = vpop.permute.xlu2 %227 }
 0x2b9   :  { %v190_v16 = vadd.f32 %v185_v15, %v160_v13  ;;  %vm232_vm11 = vcmp.eq.s32.totalorder %v228_v32, 1 }
 0x2bb   :  { %v220_v19 = vadd.f32 %v215_v17, %v190_v16 }
 0x2bd   :  { %v645_v22 = vmul.f32 0.125, %v220_v19 }
 0x2bf   :  { %v364_v25 = vmul.f32 %v363_v20, %v645_v22  ;;  %v350_v26 = vmul.f32 %v349_v21, %v645_v22  ;;  %v272_v54 = vmul.f32 %v271_v52, %v645_v22  ;;  %v346_v13 = vmul.f32 %v345_v7, %v645_v22 }
 0x2c0   :  { %v217_v27 = vpop.permute.xlu1 %216 }
 0x2c1   :  { %v221_v28 = vadd.f32 %v217_v27, %v191_v24  ;;  %368 = vrot.lane.b32.xlu1 %v364_v25, %s502_s3  ;;  %354 = vrot.lane.b32.xlu2 %v350_v26, %s503_s13  ;;  %v419_v24 = vstv %s453_s24 }
 0x2c3   :  { %v651_v29 = vmul.f32 0.125, %v221_v28 }
 0x2c5   :  { %v351_v30 = vmul.f32 %v349_v21, %v651_v29  ;;  %v365_v31 = vmul.f32 %v363_v20, %v651_v29  ;;  %v273_v55 = vmul.f32 %v271_v52, %v651_v29  ;;  %v287_v57 = vmul.f32 %v285_v51, %v651_v29 }
 0x2c6   :  { %v347_v9 = vmul.f32 %v345_v7, %v651_v29 }
 0x2c7   :  { %356 = vrot.lane.b32.xlu0 %v351_v30, %s503_s13 }
 0x2c8   :  { %v253_v34 = vpop.permute.xlu1 %252 }
 0x2c9   :  { %370 = vrot.lane.b32.xlu2 %v365_v31, %s502_s3  ;;  %vm255_vm13 = vcmp.eq.s32.totalorder %v253_v34, 1 }
 0x2f4   :  { %v239_v35 = vpop.permute.xlu2 %238 }
 0x2f5   :  { %v243_v45 = vsel %vm233_vm12, %v561_v6, %v239_v35  ;;  %v286_v6 = vmul.f32 %v285_v51, %v645_v22 }
 0x2fc   :  { %v259_v40 = vpop.permute.xlu2 %258 }
 0x31b   :  { %v355_v3 = vpop.permute.xlu2 %354 }
 0x31c   :  { %v237_v37 = vpop.permute.xlu1 %236  ;;  %v360_v14 = vadd.f32 %v355_v3, %v346_v13 }
 0x31d   :  { %v242_v41 = vsel %vm232_vm11, %v543_v1, %v237_v37 }
 0x31e   :  { %v264_v42 = vsel %vm254_vm10, %v242_v41, %v259_v40 }
 0x31f   :  { %v392_v43 = vmul.f32 %v391_v38, %v264_v42  ;;  %v378_v44 = vmul.f32 %v377_v39, %v264_v42  ;;  %v406_v53 = vmul.f32 %v405_v48, %v264_v42  ;;  %v300_v61 = vmul.f32 %v299_v56, %v264_v42 }
 0x320   :  { %v314_v62 = vmul.f32 %v313_v59, %v264_v42  ;;  %v328_v63 = vmul.f32 %v327_v60, %v264_v42 }
 0x321   :  { %396 = vrot.lane.b32.xlu2 %v392_v43, %s504_s17  ;;  %382 = vrot.lane.b32.xlu0 %v378_v44, %s499_s30 }
 0x323   :  { %v371_v5 = vpop.permute.xlu2 %370 }
 0x324   :  { %v261_v46 = vpop.permute.xlu1 %260 }
 0x325   :  { %v265_v47 = vsel %vm255_vm13, %v243_v45, %v261_v46 }
 0x326   :  { %v379_v49 = vmul.f32 %v377_v39, %v265_v47  ;;  %v407_v1 = vmul.f32 %v405_v48, %v265_v47  ;;  %v393_v50 = vmul.f32 %v391_v38, %v265_v47  ;;  %v301_v58 = vmul.f32 %v299_v56, %v265_v47 }
 0x327   :  { %v315_v0 = vmul.f32 %v313_v59, %v265_v47  ;;  %v329_v2 = vmul.f32 %v327_v60, %v265_v47  ;;  %v269_v38 = vmul.f32 %v267_v36, %v651_v29  ;;  %v268_v29 = vmul.f32 %v267_v36, %v645_v22 }
 0x328   :  { %384 = vrot.lane.b32.xlu1 %v379_v49, %s499_s30  ;;  %v341_v49 = vstv %s446_s1 }
 0x329   :  { %412 = vrot.lane.b32.xlu2 %v407_v1, %s505_s20  ;;  %398 = vrot.lane.b32.xlu0 %v393_v50, %s504_s17 }
 0x330   :  { %410 = vrot.lane.b32.xlu1 %v406_v53, %s505_s20 }
 0x331   :  { %290 = vrot.lane.b32.xlu2 %v286_v6, %s502_s3  ;;  %276 = vrot.lane.b32.xlu0 %v272_v54, %s503_s13 }
 0x333   :  { %v369_v8 = vpop.permute.xlu1 %368 }
 0x334   :  { %v374_v17 = vadd.f32 %v369_v8, %v360_v14 }
 0x338   :  { %278 = vrot.lane.b32.xlu1 %v273_v55, %s503_s13 }
 0x339   :  { %292 = vrot.lane.b32.xlu0 %v287_v57, %s502_s3  ;;  %306 = vrot.lane.b32.xlu2 %v301_v58, %s499_s30  ;;  %v357_v4 = vpop.permute.xlu0 %356 }
 0x33a   :  { %v361_v12 = vadd.f32 %v357_v4, %v347_v9 }
 0x33c   :  { %v375_v15 = vadd.f32 %v371_v5, %v361_v12 }
 0x340   :  { %304 = vrot.lane.b32.xlu1 %v300_v61, %s499_s30 }
 0x341   :  { %318 = vrot.lane.b32.xlu0 %v314_v62, %s504_s17  ;;  %332 = vrot.lane.b32.xlu2 %v328_v63, %s505_s20 }
 0x348   :  { %320 = vrot.lane.b32.xlu1 %v315_v0, %s504_s17 }
 0x349   :  { %334 = vrot.lane.b32.xlu0 %v329_v2, %s505_s20 }
 0x37b   :  { %v397_v11 = vpop.permute.xlu2 %396 }
 0x383   :  { %v413_v23 = vpop.permute.xlu2 %412 }
 0x38b   :  { %v291_v34 = vpop.permute.xlu2 %290 }
 0x393   :  { %v383_v10 = vpop.permute.xlu0 %382  ;;  %v307_v40 = vpop.permute.xlu2 %306 }
 0x394   :  { %v388_v20 = vadd.f32 %v383_v10, %v374_v17 }
 0x396   :  { %v402_v26 = vadd.f32 %v397_v11, %v388_v20 }
 0x39a   :  { %v385_v16 = vpop.permute.xlu1 %384 }
 0x39b   :  { %v389_v18 = vadd.f32 %v385_v16, %v375_v15  ;;  %v399_v19 = vpop.permute.xlu0 %398  ;;  %v333_v46 = vpop.permute.xlu2 %332 }
 0x39d   :  { %v403_v21 = vadd.f32 %v399_v19, %v389_v18 }
 0x39f   :  { %v417_v25 = vadd.f32 %v413_v23, %v403_v21 }
 0x3a1   :  { %v421_v27 = vadd.f32 %v419_v24, %v417_v25 }
 0x3a2   :  { %v411_v28 = vpop.permute.xlu1 %410 }
 0x3a3   :  { %v416_v30 = vadd.f32 %v411_v28, %v402_v26  ;;  %426 = vrot.lane.b32.xlu2 %v421_v27, %s506_s25  ;;  %v277_v32 = vpop.permute.xlu0 %276 }
 0x3a4   :  { %v282_v52 = vadd.f32 %v277_v32, %v268_v29 }
 0x3a5   :  { %v420_v31 = vadd.f32 %v419_v24, %v416_v30 }
 0x3a6   :  { %v296_v53 = vadd.f32 %v291_v34, %v282_v52 }
 0x3a7   :  { %424 = vrot.lane.b32.xlu1 %v420_v31, %s506_s25 }
 0x3aa   :  { %v279_v33 = vpop.permute.xlu1 %278 }
 0x3ab   :  { %v293_v35 = vpop.permute.xlu0 %292  ;;  %v283_v39 = vadd.f32 %v279_v33, %v269_v38 }
 0x3ad   :  { %v297_v42 = vadd.f32 %v293_v35, %v283_v39 }
 0x3af   :  { %v311_v44 = vadd.f32 %v307_v40, %v297_v42 }
 0x3b2   :  { %v305_v37 = vpop.permute.xlu1 %304 }
 0x3b3   :  { %v319_v41 = vpop.permute.xlu0 %318  ;;  %v310_v6 = vadd.f32 %v305_v37, %v296_v53 }
 0x3b5   :  { %v324_v54 = vadd.f32 %v319_v41, %v310_v6 }
 0x3b7   :  { %v338_v55 = vadd.f32 %v333_v46, %v324_v54 }
 0x3b9   :  { %v342_v56 = vadd.f32 %v341_v49, %v338_v55 }
 0x3ba   :  { %v321_v43 = vpop.permute.xlu1 %320 }
 0x3bb   :  { %v325_v45 = vadd.f32 %v321_v43, %v311_v44  ;;  %v335_v47 = vpop.permute.xlu0 %334 }
 0x3bd   :  { %v339_v48 = vadd.f32 %v335_v47, %v325_v45 }
 0x3bf   :  { %v343_v1 = vadd.f32 %v341_v49, %v339_v48 }
 0x3fd   :  { %v427_v50 = vpop.permute.xlu2 %426 }
 0x3fe   :  { %v432_v51 = vsel %vm430_vm14, %v343_v1, %v427_v50 }
 0x3ff   :  { %435 = vst.msk [vmem:[%s693_s4 + $0x8] sm:$0xff] %vm433_vm15, %v432_v51 }
 0x419   :  { %v425_v57 = vpop.permute.xlu1 %424 }
 0x41a   :  { %v431_v58 = vsel %vm430_vm14, %v342_v56, %v425_v57 }
 0x41b   :  { %434 = vst.msk [vmem:[%s693_s4] sm:$0xff] %vm433_vm15, %v431_v58 }
 0x41c   :  { %440 = vsyncpa [#allocation3], 1 }

</bundles_post_ra>
